<compile_context>
chip_gen: v7x
topology: tpu7x:2x2x1
jax: 0.10.0
libtpu: 0.0.40
codegen_flags: <defaults>
</compile_context>

<pallas_src>
import functools

import jax
import jax.numpy as jnp
from jax.experimental import pallas as pl
from jax.experimental.pallas import tpu as pltpu

_LANE = 128
_SUBLANE = 8


def _round_up(x, m):
    return (x + m - 1) // m * m


def _mlp_kernel(x_ref, w_ref, o_ref, h_ref, *, n_layers, apply_relu, in_dim, k_pad, n_pad):
    """One grid step = one layer (layer axis is the innermost, 'arbitrary' grid dim).

    x_ref: [b_tile, in_dim]       raw input tile (consumed only at layer 0)
    w_ref: [1, k_pad, n_pad]      this layer's weight, [in, out], zero-padded
    o_ref: [b_tile, n_pad]        padded output tile (written only on the last layer)
    h_ref: [b_tile, n_pad] VMEM   running activation, persists across the layer axis
    """
    l = pl.program_id(1)
    last = l == n_layers - 1

    # Layer 0: fold the column pad of x into the activation init (no wrapper pad copy).
    @pl.when(l == 0)
    def _():
        if in_dim < n_pad:
            h_ref[...] = jnp.zeros_like(h_ref)
        h_ref[:, :in_dim] = x_ref[...].astype(h_ref.dtype)

    # Contract only the first k_pad columns of the activation (weight rows beyond the
    # layer's real in_features are zero, as are the matching activation columns).
    y = jnp.dot(h_ref[:, :k_pad], w_ref[0], preferred_element_type=jnp.float32)

    @pl.when(l < n_layers - 1)
    def _():
        h_ref[...] = jnp.maximum(y, 0.0) if apply_relu else y

    @pl.when(last)
    def _():
        o_ref[...] = y.astype(o_ref.dtype)


def prepare_mlp_params(params):
    """One-time prep (NOT per forward): transpose each PyTorch-layout weight
    [out, in] -> [in, out], zero-pad the contracting dim to round_up(max in_features, 8)
    and the output dim to round_up(max out_features, 128), and stack to [L, k_pad, n_pad].

    Valid only for bias-free layers (padded rows/cols stay exactly zero through ReLU).
    """
    ks = [int(w.shape[1]) for w in params]  # in_features per layer
    ns = [int(w.shape[0]) for w in params]  # out_features per layer
    k_pad = _round_up(max(ks), _SUBLANE)
    n_pad = _round_up(max(ns), _LANE)
    n_pad = max(n_pad, _round_up(k_pad, _LANE))  # activation buffer must hold both widths
    stacked = [
        jnp.pad(w.T, ((0, k_pad - w.shape[1]), (0, n_pad - w.shape[0])))
        for w in params
    ]
    return jnp.stack(stacked)  # [L, k_pad, n_pad]


def mlp_forward(w_all, x, activation_type: str, out_dim: int):
    """Fused forward: (Linear -> act) * len(hidden_dims), then final Linear."""
    assert activation_type in ("ReLU", "linear")
    B, in_dim = x.shape
    L, k_pad, n_pad = w_all.shape

    # Rows padded to a sublane multiple only if needed (no column pad — that happens
    # inside the kernel at layer 0).  For batch % 8 == 0 this is a no-op (no copy).
    b_pad = _round_up(B, _SUBLANE)
    b_tile = min(b_pad, 256)
    b_pad = _round_up(b_pad, b_tile)
    if b_pad != B:
        x = jnp.pad(x, ((0, b_pad - B), (0, 0)))

    kernel = functools.partial(
        _mlp_kernel,
        n_layers=L,
        apply_relu=(activation_type == "ReLU"),
        in_dim=in_dim,
        k_pad=k_pad,
        n_pad=n_pad,
    )

    out_p = pl.pallas_call(
        kernel,
        out_shape=jax.ShapeDtypeStruct((b_pad, n_pad), x.dtype),
        grid_spec=pltpu.PrefetchScalarGridSpec(
            num_scalar_prefetch=0,
            grid=(b_pad // b_tile, L),
            in_specs=[
                # x: full-extent along features (exempt from the 128 rule); same block
                # for every layer step, so it is DMA'd once per batch tile.
                pl.BlockSpec((b_tile, in_dim), lambda b, l: (b, 0)),
                # one layer's weight per grid step -> double-buffered weight streaming.
                pl.BlockSpec((1, k_pad, n_pad), lambda b, l: (l, 0, 0)),
            ],
            out_specs=pl.BlockSpec((b_tile, n_pad), lambda b, l: (b, 0)),
            scratch_shapes=[pltpu.VMEM((b_tile, n_pad), jnp.float32)],
        ),
        compiler_params=pltpu.CompilerParams(
            # batch axis parallel (v7x 2-TC), layer axis sequential (carried activation).
            dimension_semantics=("parallel", "arbitrary"),
        ),
    )(x, w_all)

    # Slice to the final layer's true out_features (== input_dim for this module).
    return out_p[:B, :out_dim]


def init_mlp_params(key, input_dim, hidden_dims):
    """Deterministic PyTorch-shaped weights: Linear(prev, h, bias=False) -> W [h, prev]."""
    dims = [input_dim] + list(hidden_dims) + [input_dim]
    params = []
    for i in range(len(dims) - 1):
        key, sub = jax.random.split(key)
        fan_in, fan_out = dims[i], dims[i + 1]
        bound = 1.0 / jnp.sqrt(jnp.asarray(fan_in, jnp.float32))
        # PyTorch nn.Linear weight shape is [out_features, in_features]
        w = jax.random.uniform(
            sub, (fan_out, fan_in), jnp.float32, minval=-bound, maxval=bound
        )
        params.append(w)
    return params


def mlp_reference(params, x, activation_type: str):
    """Pure-JAX reference (PyTorch semantics) for correctness check."""
    n_layers = len(params)
    h = x
    for i, w in enumerate(params):
        h = h @ w.T
        if i < n_layers - 1 and activation_type == "ReLU":
            h = jnp.maximum(h, 0.0)
    return h


if __name__ == "__main__":
    key = jax.random.PRNGKey(0)
    batch = 8
    input_dim = 16
    hidden_dims = [32, 64, 32]
    activation_type = "ReLU"

    kx, kp = jax.random.split(key)
    x = jax.random.normal(kx, (batch, input_dim), jnp.float32)
    params = init_mlp_params(kp, input_dim, hidden_dims)

    # One-time weight prep (transpose + minimal pad + stack); reused across forward calls.
    w_all = prepare_mlp_params(params)
    out_dim = int(params[-1].shape[0])

    out = mlp_forward(w_all, x, activation_type, out_dim)
    out = jax.block_until_ready(out)

    ref = mlp_reference(params, x, activation_type)
    assert out.shape == (batch, out_dim), out.shape
    assert jnp.allclose(out, ref, atol=1e-5, rtol=1e-5), "mismatch vs reference"

    print("KERNEL_OK")
</pallas_src>

<mosaic_0001>
module attributes {stable_mosaic.version = 11 : i64} {
  func.func @_mlp_kernel(%arg0: i32, %arg1: i32, %arg2: memref<8x16xf32, #tpu.memory_space<vmem>>, %arg3: memref<1x64x128xf32, #tpu.memory_space<vmem>>, %arg4: memref<8x128xf32, #tpu.memory_space<vmem>>, %arg5: memref<8x128xf32, #tpu.memory_space<vmem>>) attributes {dimension_semantics = [#tpu.dimension_semantics<parallel>, #tpu.dimension_semantics<arbitrary>], iteration_bounds = array<i64: 1, 4>, scalar_prefetch = 0 : i64, scratch_operands = 1 : i64, tpu.core_type = #tpu.core_type<tc>, window_params = [{transform_indices = @transform_0, window_bounds = array<i64: 8, 16>}, {transform_indices = @transform_1, window_bounds = array<i64: 1, 64, 128>}, {transform_indices = @transform_2, window_bounds = array<i64: 8, 128>}]} {
    %c3_i32 = arith.constant 3 : i32
    %0 = arith.cmpi eq, %arg1, %c3_i32 : i32
    %c0_i32 = arith.constant 0 : i32
    %1 = arith.cmpi eq, %arg1, %c0_i32 : i32
    %2 = arith.extui %1 : i1 to i32
    %c0_i32_0 = arith.constant 0 : i32
    %3 = arith.cmpi ne, %2, %c0_i32_0 : i32
    scf.if %3 {
      %cst_8 = arith.constant 0.000000e+00 : f32
      %13 = vector.broadcast %cst_8 : f32 to vector<8x128xf32>
      %c0_9 = arith.constant 0 : index
      %c0_10 = arith.constant 0 : index
      %14 = vector.load %arg5[%c0_9, %c0_10] : memref<8x128xf32, #tpu.memory_space<vmem>>, vector<8x128xf32>
      tpu.vector_store %arg5[%c0_9, %c0_10], %13 {strides = array<i32>} : memref<8x128xf32, #tpu.memory_space<vmem>>, vector<8x128xf32>,
      %c0_11 = arith.constant 0 : index
      %c0_12 = arith.constant 0 : index
      %15 = vector.load %arg2[%c0_11, %c0_12] : memref<8x16xf32, #tpu.memory_space<vmem>>, vector<8x16xf32>
      %c0_13 = arith.constant 0 : index
      %c0_14 = arith.constant 0 : index
      %16 = vector.load %arg5[%c0_13, %c0_14] : memref<8x128xf32, #tpu.memory_space<vmem>>, vector<8x16xf32>
      tpu.vector_store %arg5[%c0_13, %c0_14], %15 {strides = array<i32>} : memref<8x128xf32, #tpu.memory_space<vmem>>, vector<8x16xf32>,
    } else {
    }
    %c0 = arith.constant 0 : index
    %c0_1 = arith.constant 0 : index
    %4 = vector.load %arg5[%c0, %c0_1] : memref<8x128xf32, #tpu.memory_space<vmem>>, vector<8x64xf32>
    %c0_2 = arith.constant 0 : index
    %c0_3 = arith.constant 0 : index
    %c0_4 = arith.constant 0 : index
    %5 = vector.load %arg3[%c0_2, %c0_3, %c0_4] : memref<1x64x128xf32, #tpu.memory_space<vmem>>, vector<1x64x128xf32>
    %6 = vector.shape_cast %5 : vector<1x64x128xf32> to vector<64x128xf32>
    %cst = arith.constant dense<0.000000e+00> : vector<8x128xf32>
    %7 = tpu.matmul %4, %6, %cst {dimension_numbers = #tpu.dot_dimension_numbers<[1], [0], [0], [1], [0, 0, 1, 1], [], []>} : vector<8x64xf32>, vector<64x128xf32>, vector<8x128xf32> -> vector<8x128xf32>
    %c3_i32_5 = arith.constant 3 : i32
    %8 = arith.cmpi slt, %arg1, %c3_i32_5 : i32
    %9 = arith.extui %8 : i1 to i32
    %c0_i32_6 = arith.constant 0 : i32
    %10 = arith.cmpi ne, %9, %c0_i32_6 : i32
    scf.if %10 {
      %cst_8 = arith.constant 0.000000e+00 : f32
      %13 = vector.broadcast %cst_8 : f32 to vector<8x128xf32>
      %14 = arith.maximumf %7, %13 : vector<8x128xf32>
      %c0_9 = arith.constant 0 : index
      %c0_10 = arith.constant 0 : index
      %15 = vector.load %arg5[%c0_9, %c0_10] : memref<8x128xf32, #tpu.memory_space<vmem>>, vector<8x128xf32>
      tpu.vector_store %arg5[%c0_9, %c0_10], %14 {strides = array<i32>} : memref<8x128xf32, #tpu.memory_space<vmem>>, vector<8x128xf32>,
    } else {
    }
    %11 = arith.extui %0 : i1 to i32
    %c0_i32_7 = arith.constant 0 : i32
    %12 = arith.cmpi ne, %11, %c0_i32_7 : i32
    scf.if %12 {
      %c0_8 = arith.constant 0 : index
      %c0_9 = arith.constant 0 : index
      %13 = vector.load %arg4[%c0_8, %c0_9] : memref<8x128xf32, #tpu.memory_space<vmem>>, vector<8x128xf32>
      tpu.vector_store %arg4[%c0_8, %c0_9], %7 {strides = array<i32>} : memref<8x128xf32, #tpu.memory_space<vmem>>, vector<8x128xf32>,
    } else {
    }
    return
  }
  func.func @transform_0(%arg0: i32, %arg1: i32) -> (i32, i32) {
    %c0_i32 = arith.constant 0 : i32
    %c0_i32_0 = arith.constant 0 : i32
    return %arg0, %c0_i32 : i32, i32
  }
  func.func @transform_1(%arg0: i32, %arg1: i32) -> (i32, i32, i32) {
    %c0_i32 = arith.constant 0 : i32
    %c0_i32_0 = arith.constant 0 : i32
    %c0_i32_1 = arith.constant 0 : i32
    return %arg1, %c0_i32, %c0_i32_0 : i32, i32, i32
  }
  func.func @transform_2(%arg0: i32, %arg1: i32) -> (i32, i32) {
    %c0_i32 = arith.constant 0 : i32
    %c0_i32_0 = arith.constant 0 : i32
    return %arg0, %c0_i32 : i32, i32
  }
}

</mosaic_0001>

<bundles_post_ra>
// kernel: tpu_custom_call.1
= control target key start
LH: loop header
LB: loop body
LE: loop exit
PB: predicated region body
PF: predicated region fallthrough
CT: control target
= control target key end

     0   :  { %7 = vsyncpa [#allocation4], 0  ;;  %s877_s0 = inlined_call_operand.hbm [shape: f32[8,16], index: 0, kind: input, shape index: {}]   ;;  %s878_s1 = inlined_call_operand.hbm [shape: f32[4,64,128], index: 1, kind: input, shape index: {}]   ;;  %s879_s2 = inlined_call_operand.hbm [shape: f32[8,128], index: 2, kind: output, shape index: {}]  }
   0x1   :  { %8 = vsyncpa [#allocation7], 0 }
   0x2   :  { %10 = vsyncpa [#allocation7 + $0x1], 0 }
   0x3   :  { %11 = vsyncpa [#allocation5], 0  ;;  %s679_s9 = smov 0   ;;  %s681_s10 = smov 0  }
   0x4   :  { %s683_s11 = smov 0   ;;  %s685_s12 = smov 0  }
   0x5   :  { %s687_s13 = smov 0   ;;  %s689_s14 = smov 0  }
   0x6 LB: > { %s373_s15 = sadd.s32 4294967295, %s653_s14   ;;  %s62_s16 = sadd.s32 1, %s641_s11  ;;  %s653_s14 = sphi %s689_s14, %s17_s14   ;;  %s649_s13 = sphi %s687_s13, %s900_s13   ;;  %s645_s12 = sphi %s685_s12, %s899_s12   ;;  %s641_s11 = sphi %s683_s11, %s898_s11   ;;  %s637_s10 = sphi %s681_s10, %s897_s10   ;;  %s633_s9 = sphi %s679_s9, %s896_s9  }
   0x7   : > { %p69_p0 = scmp.ne.s32.totalorder %s641_s11, %s637_s10  ;;  %p70_p1 = scmp.eq.s32.totalorder %s653_s14, 0 }
   0x8   : > { %p75_p2 = scmp.ne.s32.totalorder %s637_s10, %s633_s9  ;;  %p715_p3 = scmp.eq.s32.totalorder %s373_s15, 0 }
   0x9   : > { %p71_p4 = por %p70_p1, %p69_p0  ;;  %p374_p5 = scmp.ge.s32.totalorder %s653_s14, 1 }
   0xa   : > { %s885_s17 = scalar_select %p715_p3, 1, 0 }
   0xb   : > { %p722_p6 = por %p715_p3, %p75_p2  ;;  %p112_p7 = scmp.lt.s32.totalorder %s653_s14, 5 }
   0xc   : > { %s655_s20 = smov [#allocation3]   ;;  %p451_p10 = scmp.lt.s32.totalorder %s653_s14, 4 }
   0xd   : > { %s886_s18 = scalar_select %p722_p6, 1, 0 }
   0xe   : > { %p727_p8 = pnand %p374_p5, %p112_p7  ;;  %s127_s21 = sshll.u32 %s655_s20, 4  ;;  %s128_s21 = int_to_ptr.vmem [resolvable:$true] %s127_s21 }
   0xf   : > { %s138_s22 = sand.u32 1, %s641_s11   ;;  %p741_p12 = pnand %p451_p10, %p71_p4 }
  0x10   : > { %s887_s19 = scalar_select %p727_p8, 1, 0 }
  0x11   : > { %p442_p9 = pneg %p727_p8  ;;  %s511_s27 = scalar_lea.hbm %s877_s0, 128 }
  0x12   : > { %s889_s24 = scalar_select %p741_p12, 1, 0 }
  0x13   : > { %p737_p11 = pnand %p442_p9, %p715_p3  ;;  %p512_p13 = scmp.ne.s32.totalorder %s877_s0, %s511_s27 }
  0x14   : > { %p518_p5 = scmp.lt.u32.totalorder %s511_s27, %s877_s0 }
  0x15   : > { %p513_p0 = pneg %p737_p11 }
  0x17   : > { %p514_p1 = pnand %p513_p0, %p512_p13 }
  0x19   : > { %p515_p2 = pneg %p514_p1 }
  0x1b   : > { %p520_p4 = pnand %p518_p5, %p515_p2 }
  0x1d   : > { %523 = shalt.err (!%p520_p4)
}
  0x1e   : > { %s524_s4 = scalar_lea.vmem %s128_s21, 128  ;;  %p532_p6 = scmp.lt.s32.totalorder %s128_s21, %s128_s21 }
  0x1f   : > { %p525_p7 = scmp.ne.s32.totalorder %s128_s21, %s524_s4  ;;  %p533_p3 = scmp.lt.s32.totalorder %s524_s4, %s524_s4 }
  0x21   : > { %p527_p9 = pnand %p525_p7, %p513_p0  ;;  %p534_p8 = por %p533_p3, %p532_p6 }
  0x23   : > { %p528_p10 = pneg %p527_p9 }
  0x25   : > { %p535_p12 = pnand %p534_p8, %p528_p10 }
  0x27   : > { %538 = shalt.err (!%p535_p12)
}
  0x28   : > { %445 = dma.hbm_to_vmem [thread:$0]  (!%p737_p11), %s877_s0, 128, %s128_s21, [#allocation4]  }
  0x29   : > { %s26_s7 = sadd.s32 1, %s649_s13  ;;  %s377_s8 = sshll.u32 %s138_s22, 6 }
  0x2a   : > { %p27_p13 = scmp.ge.s32.totalorder %s26_s7, 4  ;;  %s391_s9 = sshll.u32 %s649_s13, 10 }
  0x2b   : > { %s142_s20 = scalar_lea.vmem [#allocation6], %s377_s8  ;;  %s770_s27 = scalar_lea.hbm %s878_s1, %s391_s9 }
  0x2c   : > { %s149_s25 = sshll.u32 %s142_s20, 4  ;;  %s902_s7 = smov (%p27_p13, %s26_s7), 0  ;;  %s772_s25 = int_to_ptr.vmem [resolvable:$true] %s149_s25 }
  0x2d   : > { %s59_s21 = ssub.s32 %s649_s13, %s902_s7  ;;  %s782_s29 = scalar_lea.sflag [#allocation7], %s138_s22 }
  0x2e   : > { %p776_p3 = scmp.eq.s32.totalorder %s59_s21, 0  ;;  %s539_s30 = scalar_lea.hbm %s770_s27, 1024 }
  0x2f   : > { %p540_p6 = scmp.ne.s32.totalorder %s770_s27, %s539_s30  ;;  %p891_p8 = scmp.ne.s32.totalorder %s889_s24, 0 }
  0x30   : > { %s544_s5 = scalar_lea.hbm %s878_s1, 4096  ;;  %p545_p1 = scmp.lt.u32.totalorder %s770_s27, %s878_s1 }
  0x31   : > { %p541_p11 = pneg %p891_p8  ;;  %p546_p2 = scmp.lt.u32.totalorder %s544_s5, %s539_s30 }
  0x32   : > { %p548_p4 = scmp.lt.u32.totalorder %s539_s30, %s770_s27 }
  0x33   : > { %p542_p12 = pnand %p541_p11, %p540_p6  ;;  %p547_p5 = por %p546_p2, %p545_p1 }
  0x35   : > { %p543_p0 = pneg %p542_p12  ;;  %p549_p7 = por %p548_p4, %p547_p5 }
  0x37   : > { %p550_p9 = pnand %p549_p7, %p543_p0 }
  0x39   : > { %553 = shalt.err (!%p550_p9)
}
  0x3a   : > { %s554_s22 = scalar_lea.vmem %s772_s25, 1024  ;;  %s656_s9 = smov [#allocation6]  }
  0x3b   : > { %p555_p10 = scmp.ne.s32.totalorder %s772_s25, %s554_s22  ;;  %s559_s20 = sshll.u32 %s656_s9, 4  ;;  %s560_s20 = int_to_ptr.vmem [resolvable:$false] %s559_s20 }
  0x3c   : > { %s561_s23 = scalar_lea.vmem %s560_s20, 2048  ;;  %p562_p12 = scmp.lt.s32.totalorder %s772_s25, %s560_s20 }
  0x3d   : > { %p557_p13 = pnand %p555_p10, %p541_p11  ;;  %p563_p1 = scmp.lt.s32.totalorder %s561_s23, %s554_s22 }
  0x3f   : > { %p558_p6 = pneg %p557_p13  ;;  %p564_p2 = por %p563_p1, %p562_p12 }
  0x41   : > { %p565_p5 = pnand %p564_p2, %p558_p6 }
  0x43   : > { %568 = shalt.err (!%p565_p5)
}
  0x44   : > { %s657_s26 = smov 128   ;;  %s658_s21 = smov 8  }
  0x45   : > { %449 = dma.hbm_to_vmem [thread:$0]  (!%p891_p8), %s770_s27, 1024, %s772_s25, %s782_s29, %s657_s26, %s657_s26, %s658_s21  }
  0x46   : > { %s815_s30 = scalar_select %p776_p3, %s641_s11, %s62_s16  }
  0x47   : > { %p892_p11 = scmp.ne.s32.totalorder %s887_s19, 0 }
  0x48   : > { %p893_p0 = scmp.ne.s32.totalorder (!%p892_p11), %s885_s17, 0 }
  0x49   : > { %161 = sbr.rel (%p892_p11) target bundleno = 361 (0x169), region = 28 }
  0x50   : > { %620 = dma.done.wait (%p893_p0), [#allocation4], 128  }
  0x51   : > { %622 = vsyncadd (%p893_p0), [#allocation4], 4294967168  ;;  %s167_s3 = sand.u32 1, %s637_s10   ;;  %p894_p8 = scmp.ne.s32.totalorder %s886_s18, 0 }
  0x52   : > { %s382_s4 = sshll.u32 %s167_s3, 6  ;;  %s168_s5 = scalar_lea.sflag [#allocation7], %s167_s3 }
  0x53   : > { %s171_s24 = scalar_lea.vmem [#allocation6], %s382_s4 }
  0x54   : > { %624 = dma.done.wait (%p894_p8), %s168_s5, 1024  }
  0x55   : > { %626 = vsyncadd (%p894_p8), %s168_s5, 4294966272  ;;  %p383_p3 = scmp.ne.s32.totalorder %s645_s12, 0 }
  0x56   : > { %v193_v0 = vld [vmem:[#allocation3] sm:$0xff] (!%p383_p3)  ;;  %vm194_vm0 = vcmask (!%p383_p3), 130048   ;;  %v659_v1 = vmov (!%p383_p3), 0.0  }
  0x57   : > { %191 = sbr.rel (%p383_p3) target bundleno = 94 (0x5e), region = 40  ;;  %192 = vst [vmem:[#allocation2] sm:$0xff] (!%p383_p3), %v659_v1 }
  0x58   : > { %195 = vst.msk [vmem:[#allocation2] sm:$0xff] (!%p383_p3), %vm194_vm0, %v193_v0 }
  0x5e PF: > { %v197_v2 = vld [vmem:[%s171_s24] sm:$0xff]  ;;  %v198_v3 = vld [vmem:[%s171_s24 + $0x8] sm:$0xff]  ;;  %v199_v4 = vld [vmem:[%s171_s24 + $0x10] sm:$0xff]  ;;  %v660_v5 = vmov 0.0|0.0   ;;  %vm661_vm1 = vmmov 0   ;;  %v662_v8 = vmov 0.0  }
  0x5f   : > { %420 = vmatprep.subr.bf16.mxu0 %v660_v5  ;;  %v421_v6 = vpack.c.bf16 %v198_v3, %v197_v2  ;;  %v200_v7 = vld [vmem:[%s171_s24 + $0x18] sm:$0xff]  ;;  %417 = vmatprep.mubr.msk.f32.mxu0 %vm661_vm1, %v662_v8  ;;  %v201_v10 = vld [vmem:[%s171_s24 + $0x20] sm:$0xff]  ;;  %v202_v11 = vld [vmem:[%s171_s24 + $0x28] sm:$0xff]  ;;  %vm205_vm2 = vcmask 523264   ;;  %p385_p4 = scmp.ge.s32.totalorder %s645_s12, 3 }
  0x60   : > { %v424_v9 = vpack.c.bf16 %v200_v7, %v199_v4  ;;  %v427_v12 = vpack.c.bf16 %v202_v11, %v201_v10  ;;  %v203_v13 = vld [vmem:[%s171_s24 + $0x30] sm:$0xff]  ;;  %v204_v14 = vld [vmem:[%s171_s24 + $0x38] sm:$0xff] }
  0x61   : > { %422 = vmatpush3.bf16.msra.mxu0 %v421_v6  ;;  %v430_v15 = vpack.c.bf16 %v204_v14, %v203_v13  ;;  %v196_v16 = vld [vmem:[#allocation2] sm:$0xff] }
  0x62   : > { %423 = vmatprep.subr.bf16.mxu0 %v660_v5 }
  0x65   : > { %425 = vmatpush3.bf16.msra.mxu0 %v424_v9 }
  0x66   : > { %426 = vmatprep.subr.bf16.mxu0 %v660_v5 }
  0x69   : > { %428 = vmatpush3.bf16.msra.mxu0 %v427_v12 }
  0x6a   : > { %429 = vmatprep.subr.bf16.mxu0 %v660_v5 }
  0x6d   : > { %431 = vmatpush3.bf16.msra.mxu0 %v430_v15 }
  0x70   : > { %418 = vmatmul.mubr.msk.f32.vlgmr.msra.gmra.mrb[0].mxu0 %vm205_vm2, %v196_v16 }
 0x13e   : > { %282 = sbr.rel (%p385_p4) target bundleno = 327 (0x147), region = 44 }
 0x143   : > { %v275_v17 = vpop.f32.mrb[0].mxu0 }
 0x144   : > { %v419_v18 = vpop.f32.mrb[1].mxu0  ;;  %v283_v19 = vmax.f32 (!%p385_p4), %v275_v17, 0.0 }
 0x146   : > { %284 = vst [vmem:[#allocation2] sm:$0xff] %v283_v19 }
 0x147 PF: > { %p386_p7 = scmp.ne.s32.totalorder %s645_s12, 3 }
 0x148   : > { %288 = vst [vmem:[#allocation8] sm:$0xff] (!%p386_p7), %v275_v17 }
 0x149   : > { %287 = sbr.rel (%p386_p7) target bundleno = 336 (0x150), region = 48 }
 0x150 PF: > { %p833_p9 = scmp.eq.s32.totalorder %s373_s15, 3  ;;  %s663_s17 = smov [#allocation8]  }
 0x151   : > { %s298_s18 = sshll.u32 %s663_s17, 4  ;;  %s299_s18 = int_to_ptr.vmem [resolvable:$true] %s298_s18 }
 0x152   : > { %s569_s19 = scalar_lea.vmem %s299_s18, 128  ;;  %p576_p12 = scmp.lt.s32.totalorder %s299_s18, %s299_s18 }
 0x153   : > { %p570_p10 = scmp.ne.s32.totalorder %s299_s18, %s569_s19  ;;  %p577_p1 = scmp.lt.s32.totalorder %s569_s19, %s569_s19 }
 0x155   : > { %p571_p13 = pnand %p570_p10, %p833_p9  ;;  %p578_p2 = por %p577_p1, %p576_p12 }
 0x157   : > { %p572_p6 = pneg %p571_p13 }
 0x159   : > { %p579_p5 = pnand %p578_p2, %p572_p6 }
 0x15b   : > { %582 = shalt.err (!%p579_p5)
}
 0x15c   : > { %s583_s15 = scalar_lea.hbm %s879_s2, 128 }
 0x15d   : > { %p584_p11 = scmp.ne.s32.totalorder %s879_s2, %s583_s15  ;;  %p589_p3 = scmp.lt.u32.totalorder %s583_s15, %s879_s2 }
 0x15f   : > { %p585_p0 = pnand %p584_p11, %p833_p9 }
 0x161   : > { %p586_p8 = pneg %p585_p0 }
 0x163   : > { %p591_p4 = pnand %p589_p3, %p586_p8 }
 0x165   : > { %594 = shalt.err (!%p591_p4)
}
 0x166   : > { %439 = dma.vmem_to_hbm [thread:$0]  (%p833_p9), %s299_s18, 128, %s879_s2, [#allocation5]  }
 0x167   : > { %628 = dma.done.wait (%p833_p9), [#allocation5], 128  }
 0x168   : > { %630 = vsyncadd (%p833_p9), [#allocation5], 4294967168 }
 0x169 PF: > { %s17_s14 = sadd.s32 1, %s653_s14   ;;  %s896_s9 = smov %s637_s10 }
 0x16a   : > { %p14_p7 = scmp.ge.s32.totalorder %s17_s14, 6   ;;  %s897_s10 = smov %s641_s11 }
 0x16b   : > { %s898_s11 = smov %s815_s30  ;;  %s899_s12 = smov %s649_s13 }
 0x16c   : > { %s900_s13 = smov %s902_s7  ;;  %16 = sbr.rel (!%p14_p7) target bundleno = 6 (0x6), region = 84 }
 0x173   :  { %311 = vsyncpa [#allocation4], 1 }
 0x174   :  { %313 = vsyncpa [#allocation4 + $0x1], 1 }
 0x175   :  { %314 = vsyncpa [#allocation7], 1 }
 0x176   :  { %316 = vsyncpa [#allocation7 + $0x1], 1 }
 0x177   :  { %317 = vsyncpa [#allocation5], 1 }
 0x178   :  { %319 = vsyncpa [#allocation5 + $0x1], 1 }

</bundles_post_ra>
